<compile_context>
chip_gen: v6e
topology: v6e:2x2x1
jax: 0.10.0
libtpu: 0.0.40
codegen_flags: <defaults>
</compile_context>

<pallas_src>
import functools

import jax
import jax.numpy as jnp
from jax.experimental import pallas as pl
from jax.experimental.pallas import tpu as pltpu


def _round_up(x, m):
    return ((x + m - 1) // m) * m


def baseline_kernel(batch_ref, x_ref, w_ref, b_ref, o_ref, acc_ref):
    # batch_ref: (1, TN)  int32 -- graph id per node (padded cols hold id == B)
    # x_ref:     (TN, C_in) f32 -- node-feature tile (padded rows are zero)
    # w_ref:     (C_in, C_out) f32 -- Linear weight transposed (resident)
    # b_ref:     (1, C_out) f32    -- Linear bias (resident)
    # o_ref:     (B, C_out) f32    -- per-graph output (resident)
    # acc_ref:   (B, C_in)  f32    -- pooled-sum accumulator (VMEM scratch)
    k = pl.program_id(0)

    @pl.when(k == 0)
    def _init():
        acc_ref[...] = jnp.zeros_like(acc_ref)

    B = acc_ref.shape[0]
    TN = x_ref.shape[0]

    # One-hot segment matrix for this node tile; padded columns (batch id >= B)
    # match no row and therefore contribute zero.
    batch = batch_ref[...]                                       # (1, TN)
    seg = jax.lax.broadcasted_iota(jnp.int32, (B, TN), 0)        # (B, TN)
    sel = (seg == batch).astype(jnp.float32)

    # global_add_pool partial sum on the MXU (K = TN is the big contraction).
    acc_ref[...] += jnp.dot(sel, x_ref[...],
                            preferred_element_type=jnp.float32)  # (B, C_in)

    @pl.when(k == pl.num_programs(0) - 1)
    def _finalize():
        # Linear: y = pooled @ W^T + b   (w_ref already holds W^T)
        y = jnp.dot(acc_ref[...], w_ref[...],
                    preferred_element_type=jnp.float32) + b_ref[...]
        # LeakyReLU (default negative_slope = 0.01)
        o_ref[...] = jnp.where(y > 0, y, 0.01 * y).astype(o_ref.dtype)


@functools.partial(jax.jit, static_argnames=("num_graphs", "tn"))
def baseline_forward(x, batch, weight, bias, num_graphs, tn=None):
    """x: [N, C_in] f32, batch: [N] int32, weight: [C_out, C_in], bias: [C_out]."""
    N, c_in = x.shape
    c_out = weight.shape[0]
    B = int(num_graphs)

    # Node tile: multiple of 128 (lane-aligned batch block, non-degenerate MXU K),
    # capped at 1024 so double-buffered tiles fit v7x's 32 MiB scoped VMEM easily.
    if tn is None:
        tn = min(1024, _round_up(N, 128))
    tn = int(tn)
    assert tn % 128 == 0, "node tile must be a multiple of 128"

    n_pad = _round_up(N, tn)
    num_tiles = n_pad // tn

    # Pad: zero rows for x, out-of-range graph id (== B) for batch so the padded
    # one-hot columns are all zero (matches segment_sum semantics).
    x_p = jnp.pad(x.astype(jnp.float32), ((0, n_pad - N), (0, 0)))
    batch_p = jnp.pad(batch.astype(jnp.int32), (0, n_pad - N),
                      constant_values=B).reshape(1, n_pad)

    w_t = weight.T.astype(jnp.float32)            # (C_in, C_out)
    b2d = bias.reshape(1, c_out).astype(jnp.float32)

    # VMEM budget: double-buffered x/batch tiles + resident weight/bias/output
    # + accumulator scratch, with headroom.
    vmem_bytes = (2 * (tn * c_in * 4 + tn * 4)
                  + c_in * c_out * 4 + c_out * 4
                  + 2 * B * c_out * 4 + B * c_in * 4
                  + (4 << 20))
    vmem_bytes = min(max(vmem_bytes, 16 << 20), 100 << 20)

    cost = pl.CostEstimate(
        flops=2 * B * n_pad * c_in + 2 * B * c_in * c_out,
        transcendentals=0,
        bytes_accessed=(n_pad * c_in * 4 + n_pad * 4
                        + c_in * c_out * 4 + c_out * 4 + B * c_out * 4),
    )

    return pl.pallas_call(
        baseline_kernel,
        out_shape=jax.ShapeDtypeStruct((B, c_out), jnp.float32),
        grid_spec=pltpu.PrefetchScalarGridSpec(
            num_scalar_prefetch=0,
            grid=(num_tiles,),
            in_specs=[
                pl.BlockSpec((1, tn), lambda k: (0, k)),        # batch ids tile
                pl.BlockSpec((tn, c_in), lambda k: (k, 0)),     # x tile
                pl.BlockSpec((c_in, c_out), lambda k: (0, 0)),  # W^T (resident)
                pl.BlockSpec((1, c_out), lambda k: (0, 0)),     # bias (resident)
            ],
            out_specs=pl.BlockSpec((B, c_out), lambda k: (0, 0)),  # resident acc'd output
            scratch_shapes=[pltpu.VMEM((B, c_in), jnp.float32)],
        ),
        compiler_params=pltpu.CompilerParams(
            dimension_semantics=("arbitrary",),   # N is a reduction axis
            vmem_limit_bytes=vmem_bytes,
        ),
        cost_estimate=cost,
    )(batch_p, x_p, w_t, b2d)


if __name__ == "__main__":
    key = jax.random.PRNGKey(0)
    k_x, k_w, k_b, k_batch = jax.random.split(key, 4)

    # Small synthetic graph batch: N nodes split across B graphs.
    N = 300          # total nodes (not a multiple of the tile -> exercises tail padding)
    B = 4            # number of graphs
    in_channels = 8
    out_channels = 16

    x = jax.random.normal(k_x, (N, in_channels), dtype=jnp.float32)
    # PyG-style sorted batch assignment
    batch = jnp.sort(jax.random.randint(k_batch, (N,), 0, B)).astype(jnp.int32)

    # Deterministic Linear init (matching nn.Linear's uniform(-1/sqrt(fan_in), ...))
    bound = 1.0 / (in_channels ** 0.5)
    weight = jax.random.uniform(k_w, (out_channels, in_channels),
                                minval=-bound, maxval=bound, dtype=jnp.float32)
    bias = jax.random.uniform(k_b, (out_channels,),
                              minval=-bound, maxval=bound, dtype=jnp.float32)

    # tn=128 -> padded N = 384 -> grid of 3 tiles (exercises init/accumulate/finalize).
    out = baseline_forward(x, batch, weight, bias, B, tn=128)
    out = jax.block_until_ready(out)

    # Pure-JAX reference check
    pooled_ref = jax.ops.segment_sum(x, batch, num_segments=B)
    y_ref = pooled_ref @ weight.T + bias
    ref = jnp.where(y_ref > 0, y_ref, 0.01 * y_ref)
    assert jnp.allclose(out, ref, atol=1e-4, rtol=1e-4), "mismatch vs reference"

    print("KERNEL_OK")
</pallas_src>

<mosaic_0001>
module attributes {stable_mosaic.version = 11 : i64} {
  func.func @baseline_kernel(%arg0: i32, %arg1: memref<1x128xi32, #tpu.memory_space<vmem>>, %arg2: memref<128x8xf32, #tpu.memory_space<vmem>>, %arg3: memref<8x16xf32, #tpu.memory_space<vmem>>, %arg4: memref<1x16xf32, #tpu.memory_space<vmem>>, %arg5: memref<4x16xf32, #tpu.memory_space<vmem>>, %arg6: memref<4x8xf32, #tpu.memory_space<vmem>>) attributes {dimension_semantics = [#tpu.dimension_semantics<arbitrary>], iteration_bounds = array<i64: 3>, scalar_prefetch = 0 : i64, scratch_operands = 1 : i64, tpu.core_type = #tpu.core_type<tc>, window_params = [{transform_indices = @transform_0, window_bounds = array<i64: 1, 128>}, {transform_indices = @transform_1, window_bounds = array<i64: 128, 8>}, {pipeline_mode = #tpu.pipeline_mode<synchronous>, transform_indices = @transform_2, window_bounds = array<i64: 8, 16>}, {pipeline_mode = #tpu.pipeline_mode<synchronous>, transform_indices = @transform_3, window_bounds = array<i64: 1, 16>}, {pipeline_mode = #tpu.pipeline_mode<synchronous>, transform_indices = @transform_4, window_bounds = array<i64: 4, 16>}]} {
    %c0_i32 = arith.constant 0 : i32
    %0 = arith.cmpi eq, %arg0, %c0_i32 : i32
    %1 = arith.extui %0 : i1 to i32
    %c0_i32_0 = arith.constant 0 : i32
    %2 = arith.cmpi ne, %1, %c0_i32_0 : i32
    scf.if %2 {
      %cst_9 = arith.constant 0.000000e+00 : f32
      %17 = vector.broadcast %cst_9 : f32 to vector<4x8xf32>
      %c0_10 = arith.constant 0 : index
      %c0_11 = arith.constant 0 : index
      %18 = vector.load %arg6[%c0_10, %c0_11] : memref<4x8xf32, #tpu.memory_space<vmem>>, vector<4x8xf32>
      tpu.vector_store %arg6[%c0_10, %c0_11], %17 {strides = array<i32>} : memref<4x8xf32, #tpu.memory_space<vmem>>, vector<4x8xf32>,
    } else {
    }
    %c0 = arith.constant 0 : index
    %c0_1 = arith.constant 0 : index
    %3 = vector.load %arg1[%c0, %c0_1] : memref<1x128xi32, #tpu.memory_space<vmem>>, vector<1x128xi32>
    %4 = tpu.iota {dimensions = array<i32: 0>} : vector<4x128xi32>
    %5 = vector.broadcast %3 : vector<1x128xi32> to vector<4x128xi32>
    %6 = arith.cmpi eq, %4, %5 : vector<4x128xi32>
    %7 = arith.extui %6 : vector<4x128xi1> to vector<4x128xi32>
    %8 = arith.sitofp %7 : vector<4x128xi32> to vector<4x128xf32>
    %c0_2 = arith.constant 0 : index
    %c0_3 = arith.constant 0 : index
    %9 = vector.load %arg6[%c0_2, %c0_3] : memref<4x8xf32, #tpu.memory_space<vmem>>, vector<4x8xf32>
    %c0_4 = arith.constant 0 : index
    %c0_5 = arith.constant 0 : index
    %10 = vector.load %arg2[%c0_4, %c0_5] : memref<128x8xf32, #tpu.memory_space<vmem>>, vector<128x8xf32>
    %cst = arith.constant dense<0.000000e+00> : vector<4x8xf32>
    %11 = tpu.matmul %8, %10, %cst {dimension_numbers = #tpu.dot_dimension_numbers<[1], [0], [0], [1], [0, 0, 1, 1], [], []>} : vector<4x128xf32>, vector<128x8xf32>, vector<4x8xf32> -> vector<4x8xf32>
    %12 = arith.addf %9, %11 : vector<4x8xf32>
    %c0_6 = arith.constant 0 : index
    %c0_7 = arith.constant 0 : index
    %13 = vector.load %arg6[%c0_6, %c0_7] : memref<4x8xf32, #tpu.memory_space<vmem>>, vector<4x8xf32>
    tpu.vector_store %arg6[%c0_6, %c0_7], %12 {strides = array<i32>} : memref<4x8xf32, #tpu.memory_space<vmem>>, vector<4x8xf32>,
    %c2_i32 = arith.constant 2 : i32
    %14 = arith.cmpi eq, %arg0, %c2_i32 : i32
    %15 = arith.extui %14 : i1 to i32
    %c0_i32_8 = arith.constant 0 : i32
    %16 = arith.cmpi ne, %15, %c0_i32_8 : i32
    scf.if %16 {
      %c0_9 = arith.constant 0 : index
      %c0_10 = arith.constant 0 : index
      %17 = vector.load %arg6[%c0_9, %c0_10] : memref<4x8xf32, #tpu.memory_space<vmem>>, vector<4x8xf32>
      %c0_11 = arith.constant 0 : index
      %c0_12 = arith.constant 0 : index
      %18 = vector.load %arg3[%c0_11, %c0_12] : memref<8x16xf32, #tpu.memory_space<vmem>>, vector<8x16xf32>
      %cst_13 = arith.constant dense<0.000000e+00> : vector<4x16xf32>
      %19 = tpu.matmul %17, %18, %cst_13 {dimension_numbers = #tpu.dot_dimension_numbers<[1], [0], [0], [1], [0, 0, 1, 1], [], []>} : vector<4x8xf32>, vector<8x16xf32>, vector<4x16xf32> -> vector<4x16xf32>
      %c0_14 = arith.constant 0 : index
      %c0_15 = arith.constant 0 : index
      %20 = vector.load %arg4[%c0_14, %c0_15] : memref<1x16xf32, #tpu.memory_space<vmem>>, vector<1x16xf32>
      %21 = vector.broadcast %20 : vector<1x16xf32> to vector<4x16xf32>
      %22 = arith.addf %19, %21 : vector<4x16xf32>
      %cst_16 = arith.constant 0.000000e+00 : f32
      %23 = vector.broadcast %cst_16 : f32 to vector<4x16xf32>
      %24 = arith.cmpf ogt, %22, %23 : vector<4x16xf32>
      %cst_17 = arith.constant 0.00999999977 : f32
      %25 = vector.broadcast %cst_17 : f32 to vector<4x16xf32>
      %26 = arith.mulf %25, %22 : vector<4x16xf32>
      %27 = arith.select %24, %22, %26 : vector<4x16xi1>, vector<4x16xf32>
      %c0_18 = arith.constant 0 : index
      %c0_19 = arith.constant 0 : index
      %28 = vector.load %arg5[%c0_18, %c0_19] : memref<4x16xf32, #tpu.memory_space<vmem>>, vector<4x16xf32>
      tpu.vector_store %arg5[%c0_18, %c0_19], %27 {strides = array<i32>} : memref<4x16xf32, #tpu.memory_space<vmem>>, vector<4x16xf32>,
    } else {
    }
    return
  }
  func.func @transform_0(%arg0: i32) -> (i32, i32) {
    %c0_i32 = arith.constant 0 : i32
    %c0_i32_0 = arith.constant 0 : i32
    return %c0_i32, %arg0 : i32, i32
  }
  func.func @transform_1(%arg0: i32) -> (i32, i32) {
    %c0_i32 = arith.constant 0 : i32
    %c0_i32_0 = arith.constant 0 : i32
    return %arg0, %c0_i32 : i32, i32
  }
  func.func @transform_2(%arg0: i32) -> (i32, i32) {
    %c0_i32 = arith.constant 0 : i32
    %c0_i32_0 = arith.constant 0 : i32
    %c0_i32_1 = arith.constant 0 : i32
    return %c0_i32, %c0_i32_0 : i32, i32
  }
  func.func @transform_3(%arg0: i32) -> (i32, i32) {
    %c0_i32 = arith.constant 0 : i32
    %c0_i32_0 = arith.constant 0 : i32
    %c0_i32_1 = arith.constant 0 : i32
    return %c0_i32, %c0_i32_0 : i32, i32
  }
  func.func @transform_4(%arg0: i32) -> (i32, i32) {
    %c0_i32 = arith.constant 0 : i32
    %c0_i32_0 = arith.constant 0 : i32
    %c0_i32_1 = arith.constant 0 : i32
    return %c0_i32, %c0_i32_0 : i32, i32
  }
}

</mosaic_0001>

<bundles_post_ra>
// kernel: baseline_forward.1
= control target key start
LH: loop header
LB: loop body
LE: loop exit
PB: predicated region body
PF: predicated region fallthrough
CT: control target
= control target key end

     0   :  { %9 = vsyncpa [#allocation4], 0  ;;  %s618_s15 = smov 0   ;;  %s686_s0 = inlined_call_operand.vmem [shape: s32[1,384], index: 0, kind: input, shape index: {}]   ;;  %s687_s1 = inlined_call_operand.vmem [shape: f32[384,8], index: 1, kind: input, shape index: {}]   ;;  %s688_s2 = inlined_call_operand.vmem [shape: f32[8,16], index: 2, kind: input, shape index: {}]   ;;  %s689_s3 = inlined_call_operand.vmem [shape: f32[1,16], index: 3, kind: input, shape index: {}]   ;;  %s690_s4 = inlined_call_operand.hbm [shape: f32[4,16], index: 4, kind: output, shape index: {}]  }
   0x1 LB: > { %s624_s16 = sadd.s32 4294967295, %s584_s15   ;;  %p456_p0 = scmp.ge.s32.totalorder %s584_s15, 1  ;;  %s584_s15 = sphi %s618_s15, %s15_s15  }
   0x2   : > { %p167_p1 = scmp.lt.s32.totalorder %s584_s15, 4 }
   0x4   : > { %p168_p2 = pnand %p456_p0, %p167_p1 }
   0x5   : > { %p191_p3 = scmp.lt.s32.totalorder (!%p168_p2), %s624_s16, 2  ;;  %s457_s17 = sshll.u32 (!%p168_p2), %s624_s16, 4 }
   0x6   : > { %171 = sbr.rel (%p168_p2) target bundleno = 469 (0x1d5), region = 36  ;;  %p195_p4 = scmp.lt.s32.totalorder (!%p168_p2), %s457_s17, 47 }
   0x7   : > { %p459_p5 = scmp.ne.s32.totalorder (!%p168_p2), %s624_s16, 0 }
   0xb   : > { %s631_s18 = scalar_select %p191_p3, %s624_s16, 2 }
   0xc   : > { %s692_s17 = smov (!%p195_p4, %s457_s17), 47  ;;  %203 = sbr.rel (%p459_p5) target bundleno = 19 (0x13), region = 40 }
   0xd   : > { %s193_s21 = scalar_lea.vmem %s686_s0, %s631_s18  ;;  %s458_s22 = sshll.u32 %s692_s17, 3 }
   0xe   : > { %s640_s25 = scalar_lea.vmem %s687_s1, %s458_s22 }
  0x11   : > { %vm204_vm0 = vcmask 60416   ;;  %v586_v0 = vmov 0.0  }
  0x12   : > { %205 = vst.msk [vmem:[#allocation2] sm:$0xf] %vm204_vm0, %v586_v0 }
  0x13 PF: > { %v232_v1 = vld [vmem:[%s640_s25 + $0x78] sm:$0xff]  ;;  %v587_v2 = vmov 0.0   ;;  %v231_v3 = vld [vmem:[%s640_s25 + $0x70] sm:$0xff]  ;;  %vm588_vm1 = vmmov 0   ;;  %v230_v4 = vld [vmem:[%s640_s25 + $0x68] sm:$0xff]  ;;  %v207_v14 = vlaneseq  ;;  %v589_v21 = vmov 1.0  }
  0x14   : > { %489 = vmatprep.subr.mxu0 %v587_v2  ;;  %521 = vmatprep.mubr.msk.f32.mxu0 %vm588_vm1, %v587_v2  ;;  %v229_v5 = vld [vmem:[%s640_s25 + $0x60] sm:$0xff]  ;;  %v228_v6 = vld [vmem:[%s640_s25 + $0x58] sm:$0xff]  ;;  %v227_v7 = vld [vmem:[%s640_s25 + $0x50] sm:$0xff]  ;;  %vm304_vm3 = vcmask 60416   ;;  %p463_p6 = scmp.ne.s32.totalorder %s624_s16, 2 }
  0x15   : > { %490 = vmatpush3.msra.mxu0 %v232_v1  ;;  %v226_v8 = vld [vmem:[%s640_s25 + $0x48] sm:$0xff]  ;;  %v225_v9 = vld [vmem:[%s640_s25 + $0x40] sm:$0xff]  ;;  %v224_v10 = vld [vmem:[%s640_s25 + $0x38] sm:$0xff]  ;;  %v208_v17 = vshrl.u32 %v207_v14, 7 }
  0x16   : > { %491 = vmatprep.subr.mxu0 %v587_v2  ;;  %v223_v11 = vld [vmem:[%s640_s25 + $0x30] sm:$0xff]  ;;  %v222_v12 = vld [vmem:[%s640_s25 + $0x28] sm:$0xff]  ;;  %v221_v13 = vld [vmem:[%s640_s25 + $0x20] sm:$0xff] }
  0x17   : > { %492 = vmatpush3.msra.mxu0 %v231_v3  ;;  %v220_v15 = vld [vmem:[%s640_s25 + $0x18] sm:$0xff]  ;;  %v219_v16 = vld [vmem:[%s640_s25 + $0x10] sm:$0xff]  ;;  %v218_v18 = vld [vmem:[%s640_s25 + $0x8] sm:$0xff] }
  0x18   : > { %493 = vmatprep.subr.mxu0 %v587_v2  ;;  %v460_v19 = vld [vmem:[%s193_s21] ss:$0 sm:$0xff] }
  0x19   : > { %494 = vmatpush3.msra.mxu0 %v230_v4  ;;  %v217_v20 = vld [vmem:[%s640_s25] sm:$0xff]  ;;  %vm213_vm2 = vcmp.eq.s32.totalorder %v208_v17, %v460_v19 }
  0x1a   : > { %495 = vmatprep.subr.mxu0 %v587_v2  ;;  %v216_v22 = vld [vmem:[#allocation2] sm:$0xf] }
  0x1b   : > { %496 = vmatpush3.msra.mxu0 %v229_v5 }
  0x1c   : > { %497 = vmatprep.subr.mxu0 %v587_v2 }
  0x1d   : > { %498 = vmatpush3.msra.mxu0 %v228_v6 }
  0x1e   : > { %499 = vmatprep.subr.mxu0 %v587_v2 }
  0x1f   : > { %500 = vmatpush3.msra.mxu0 %v227_v7 }
  0x20   : > { %501 = vmatprep.subr.mxu0 %v587_v2 }
  0x21   : > { %502 = vmatpush3.msra.mxu0 %v226_v8 }
  0x22   : > { %503 = vmatprep.subr.mxu0 %v587_v2 }
  0x23   : > { %504 = vmatpush3.msra.mxu0 %v225_v9 }
  0x24   : > { %505 = vmatprep.subr.mxu0 %v587_v2 }
  0x25   : > { %506 = vmatpush3.msra.mxu0 %v224_v10 }
  0x26   : > { %507 = vmatprep.subr.mxu0 %v587_v2 }
  0x27   : > { %508 = vmatpush3.msra.mxu0 %v223_v11 }
  0x28   : > { %509 = vmatprep.subr.mxu0 %v587_v2 }
  0x29   : > { %510 = vmatpush3.msra.mxu0 %v222_v12 }
  0x2a   : > { %511 = vmatprep.subr.mxu0 %v587_v2 }
  0x2b   : > { %512 = vmatpush3.msra.mxu0 %v221_v13 }
  0x2c   : > { %513 = vmatprep.subr.mxu0 %v587_v2 }
  0x2d   : > { %514 = vmatpush3.msra.mxu0 %v220_v15 }
  0x2e   : > { %515 = vmatprep.subr.mxu0 %v587_v2 }
  0x2f   : > { %516 = vmatpush3.msra.mxu0 %v219_v16 }
  0x30   : > { %517 = vmatprep.subr.mxu0 %v587_v2 }
  0x31   : > { %518 = vmatpush3.msra.mxu0 %v218_v18 }
  0x32   : > { %519 = vmatprep.subr.mxu0 %v587_v2 }
  0x33   : > { %520 = vmatpush3.msra.mxu0 %v217_v20 }
  0x34   : > { %522 = vmatmul.mubr.msk.f32.vlgmr.msra.gmra.mxu0 %vm213_vm2, %v589_v21 }
  0xf3   : > { %309 = sbr.rel (%p463_p6) target bundleno = 454 (0x1c6), region = 44 }
  0xf4   : > { %v299_v23 = vpop.f32.mrf.mxu0 }
  0xf5   : > { %v303_v24 = vadd.f32 %v299_v23, %v216_v22 }
  0xf6   : > { %v523_v25 = vpop.f32.mrf.mxu0 }
  0xf7   : > { %305 = vst.msk [vmem:[#allocation2] sm:$0xf] %vm304_vm3, %v303_v24 }
  0xf8   : > { %v311_v26 = vld [vmem:[%s688_s2] sm:$0xff]  ;;  %vm319_vm4 = vcmask 64512   ;;  %v590_v28 = vmov 0.0   ;;  %vm591_vm5 = vmmov 0   ;;  %vm396_vm7 = vcmask 125952  }
  0xf9   : > { %524 = vmatprep.subr.mxu0 %v590_v28  ;;  %526 = vmatprep.mubr.msk.f32.mxu0 %vm591_vm5, %v590_v28  ;;  %v464_v29 = vld [vmem:[%s689_s3] ss:$0 sm:$0xff] }
  0xfa   : > { %525 = vmatpush3.msra.mxu0 %v311_v26 }
  0xfe   : > { %v310_v27 = vld [vmem:[#allocation2] sm:$0xf] }
  0xff   : > { %527 = vmatmul.mubr.msk.f32.vlgmr.msra.gmra.mxu0 %vm319_vm4, %v310_v27 }
 0x1bf   : > { %v389_v30 = vpop.f32.mrf.mxu0 }
 0x1c0   : > { %v390_v31 = vadd.f32 %v464_v29, %v389_v30 }
 0x1c1   : > { %v528_v32 = vpop.f32.mrf.mxu0 }
 0x1c2   : > { %vm393_vm6 = vcmp.gt.f32.partialorder %v390_v31, 0.0  ;;  %v394_v33 = vmul.f32 0.01, %v390_v31 }
 0x1c4   : > { %v395_v34 = vsel %vm393_vm6, %v390_v31, %v394_v33 }
 0x1c5   : > { %397 = vst.msk [vmem:[#allocation3] sm:$0xf] %vm396_vm7, %v395_v34 }
 0x1c6 PF: > { %p533_p7 = scmp.eq.s32.totalorder %s624_s16, 2  ;;  %s592_s6 = smov [#allocation3]  }
 0x1c7   : > { %s405_s7 = sshll.u32 %s592_s6, 4  ;;  %s406_s7 = int_to_ptr.vmem [resolvable:$true] %s405_s7 }
 0x1c8   : > { %s550_s8 = scalar_lea.vmem %s406_s7, 64  ;;  %p557_p11 = scmp.lt.s32.totalorder %s406_s7, %s406_s7 }
 0x1c9   : > { %p551_p8 = scmp.ne.s32.totalorder %s406_s7, %s550_s8  ;;  %p558_p12 = scmp.lt.s32.totalorder %s550_s8, %s550_s8 }
 0x1cb   : > { %p552_p9 = pnand %p551_p8, %p533_p7  ;;  %p559_p13 = por %p558_p12, %p557_p11 }
 0x1cd   : > { %p553_p10 = pneg %p552_p9 }
 0x1cf   : > { %p560_p0 = pnand %p559_p13, %p553_p10 }
 0x1d1   : > { %563 = shalt.err (!%p560_p0)
}
 0x1d2   : > { %530 = dma.vmem_to_hbm [thread:$0]  (%p533_p7), %s406_s7, 64, %s690_s4, [#allocation4]  }
 0x1d3   : > { %579 = dma.done.wait (%p533_p7), [#allocation4], 64  }
 0x1d4   : > { %581 = vsyncadd (%p533_p7), [#allocation4], 4294967232 }
 0x1d5 PF: > { %s15_s15 = sadd.s32 1, %s584_s15  }
 0x1d6   : > { %p12_p1 = scmp.ge.s32.totalorder %s15_s15, 5  }
 0x1d8   :  { %14 = sbr.rel (!%p12_p1) target bundleno = 1 (0x1), region = 74 }
 0x1dd   :  { %418 = vsyncpa [#allocation4], 1 }
 0x1de   :  { %420 = vsyncpa [#allocation4 + $0x1], 1 }

</bundles_post_ra>
